<compile_context>
chip_gen: v6e
topology: v6e:2x2x1
jax: 0.10.0
libtpu: 0.0.40
codegen_flags: <defaults>
</compile_context>

<pallas_src>
import functools

import numpy as np
import jax
import jax.numpy as jnp
from jax.experimental import pallas as pl
from jax.experimental.pallas import tpu as pltpu


# ----------------------------------------------------------------------------
# init-time glue (deterministic parameter setup, mirrors _get_class_weights)
# ----------------------------------------------------------------------------
def get_class_weights(class_counts: np.ndarray, normal_count: float, beta: float):
    all_counts = np.concatenate(
        [np.asarray(class_counts, np.float64), np.array([normal_count], np.float64)])
    effective_num = 1.0 - np.power(beta, all_counts)
    all_weights = (1.0 - beta) / effective_num
    all_weights = all_weights / np.sum(all_weights) * len(all_counts)
    class_weights = all_weights[:-1].astype(np.float32)
    normal_weight = float(all_weights[-1])
    return class_weights, normal_weight


def _round_up(x: int, m: int) -> int:
    return ((x + m - 1) // m) * m


# ----------------------------------------------------------------------------
# Pallas kernel
#   refs:   logits (R, TILE_B), targets (R, TILE_B)   [R = round_up(C+1, 8),
#           rows >= C are zero-padded in HBM; row C is overwritten in-kernel
#           with the meta logits/targets]
#   out:    (8, 128) partial tile per split; row 0 = numerator, row 1 = denom
#   scratch: (2, TILE_B) per-lane partial accumulator (row0 = num, row1 = den)
# ----------------------------------------------------------------------------
def hybrid_loss_kernel(logits_ref, targets_ref, out_ref, acc_ref, *,
                       batch_size, tile_b, num_classes, class_weight_values,
                       base_loss, focal_gamma, meta_loss_weight,
                       meta_loss_beta, normal_weight, exact_div):
    C = num_classes
    R = logits_ref.shape[0]
    TB = tile_b

    t_id = pl.program_id(1)
    n_t = pl.num_programs(1)

    @pl.when(t_id == 0)
    def _init():
        acc_ref[...] = jnp.zeros_like(acc_ref)

    x = logits_ref[...].astype(jnp.float32)    # (R, TB); rows >= C are 0 in HBM
    t = targets_ref[...].astype(jnp.float32)   # (R, TB)

    def fast_recip(d):
        if exact_div:
            return 1.0 / d
        inv = pl.reciprocal(d, approx=True)    # EUP vrcp (separate issue slot)
        return inv * (2.0 - d * inv)           # one Newton step -> ~1e-7 rel err

    row = jax.lax.broadcasted_iota(jnp.int32, (R, 1), 0)
    is_class_row = row < C                                            # (R, 1)

    # ---- meta ("any defect") logits / targets -------------------------------
    t_sum = jnp.sum(t, axis=0, keepdims=True)      # rows >= C are zero -> class sum
    meta_targets = jnp.clip(t_sum, 0.0, 1.0)                          # (1, TB)
    w = jnp.where(t == 0.0, meta_loss_beta, t)
    w = jnp.where(meta_targets == 0.0, 1.0, w)     # normal samples: all-ones
    w = jnp.where(is_class_row, w, 0.0)            # padding rows contribute 0
    meta_logits = jnp.sum(x * w, axis=0, keepdims=True) * fast_recip(
        jnp.sum(w, axis=0, keepdims=True))                            # (1, TB)

    # ---- fold the meta row into dead sublane row C: one transcendental pass
    all_logits = jnp.where(row == C, meta_logits, x)                  # (R, TB)
    all_targets = jnp.where(row == C, meta_targets, t)                # (R, TB)

    # ---- stable BCE-with-logits / sigmoid focal loss, elementwise -----------
    e = jnp.exp(-jnp.abs(all_logits))                                 # shared exp
    ce = (jnp.maximum(all_logits, 0.0) - all_logits * all_targets
          + jnp.log1p(e))
    if base_loss == "bce":
        loss_all = ce
    else:
        inv1pe = fast_recip(1.0 + e)
        p = jnp.where(all_logits >= 0.0, inv1pe, e * inv1pe)          # sigmoid
        p_t = p * all_targets + (1.0 - p) * (1.0 - all_targets)
        q = 1.0 - p_t
        g = float(focal_gamma)
        if g == 0.0:
            mod = jnp.ones_like(q)
        elif g.is_integer() and 0 < g <= 8:
            mod = q
            for _ in range(int(g) - 1):            # integer-gamma fast path
                mod = mod * q
        else:
            mod = jnp.power(q, g)
        loss_all = ce * mod

    # ---- defect_type_loss (sum over class rows) + meta_loss_weight * meta_loss
    #      in one weighted cross-sublane reduce; padding rows weighted 0.
    row_w = jnp.where(is_class_row, 1.0,
                      jnp.where(row == C, meta_loss_weight, 0.0))     # (R, 1)
    final_loss = jnp.sum(loss_all * row_w, axis=0, keepdims=True)     # (1, TB)

    # ---- batch balancing weights (class weights baked as constants) ---------
    cw = jnp.zeros((R, 1), jnp.float32)
    for i, wv in enumerate(class_weight_values):
        cw = jnp.where(row == i, wv, cw)
    bw = jnp.sum(cw * t, axis=0, keepdims=True)
    bw = jnp.where(bw == 0.0, normal_weight, bw)                      # (1, TB)

    # ---- mask ragged / fully-out-of-range tail columns (no wrapper batch pad)
    col = jax.lax.broadcasted_iota(jnp.int32, (1, TB), 1)
    col_start = (pl.program_id(0) * n_t + t_id) * TB
    valid = (col + col_start) < batch_size                            # (1, TB)

    # ---- packed per-lane partial accumulation: row0 = numerator, row1 = denom
    row2 = jax.lax.broadcasted_iota(jnp.int32, (2, 1), 0)
    contrib = jnp.where(row2 == 0,
                        final_loss * bw,
                        t_sum + (1.0 - meta_targets))                 # (2, TB)
    acc_ref[...] += jnp.where(valid, contrib, 0.0)

    @pl.when(t_id == n_t - 1)
    def _finalize():
        numer = jnp.sum(acc_ref[0:1, :])
        denom = jnp.sum(acc_ref[1:2, :])
        rowo = jax.lax.broadcasted_iota(jnp.int32, (8, 128), 0)
        out_ref[...] = jnp.where(rowo == 0, numer,
                                 jnp.where(rowo == 1, denom, 0.0))


# ----------------------------------------------------------------------------
# wrapper
# ----------------------------------------------------------------------------
def hybrid_loss(logits, targets, class_weights, normal_weight, *,
                base_loss="focal", focal_gamma=2.0, meta_loss_weight=1.0,
                meta_loss_beta=0.1, tile_b=32768, num_core_splits=1,
                use_core_parallel=False, exact_div=False):
    if base_loss not in ("bce", "focal"):
        raise ValueError(f"Invalid base_loss '{base_loss}'")
    B, C = logits.shape

    # class weights are static (numpy at module init) -> bake as constants.
    cw_vals = tuple(float(v)
                    for v in np.asarray(class_weights, np.float64).reshape(-1))
    if len(cw_vals) != C:
        raise ValueError("class_weights length must match num_classes")

    # Lane-dense layout: (B, C) -> (R, B), R = round_up(C+1, 8); the spare
    # sublane row C carries the meta loss inside the kernel, rows > C are zero.
    # TODO(synk): have the producer emit logits/targets already as (R, B)
    # (fold the transpose/pad into the preceding matmul) to drop this HBM pass.
    R = _round_up(C + 1, 8)
    x = jnp.pad(jnp.transpose(logits), ((0, R - C), (0, 0)))
    t = jnp.pad(jnp.transpose(targets), ((0, R - C), (0, 0)))

    S = max(int(num_core_splits), 1)
    if B < 128 * S:              # splitting tiny batches is pure overhead
        S = 1
    per_split = -(-B // S)
    tb = int(tile_b)
    if tb >= per_split:
        # single tile per split; lane dim == full dim (S==1) or 128-aligned
        tb = per_split if S == 1 else _round_up(per_split, 128)
    else:
        tb = _round_up(tb, 128)  # (8,128) legality for the BlockSpec lane dim
    tiles_per_split = -(-per_split // tb)
    last_block = -(-B // tb) - 1  # last block index that still overlaps the array

    def in_map(c, i):
        # Splits may over-cover B; a fully out-of-range step re-reads the last
        # block and is zeroed entirely by the `valid` mask inside the kernel.
        return (0, jnp.minimum(c * tiles_per_split + i, last_block))

    kernel = functools.partial(
        hybrid_loss_kernel,
        batch_size=B,
        tile_b=tb,
        num_classes=C,
        class_weight_values=cw_vals,
        base_loss=base_loss,
        focal_gamma=float(focal_gamma),
        meta_loss_weight=float(meta_loss_weight),
        meta_loss_beta=float(meta_loss_beta),
        normal_weight=float(normal_weight),
        exact_div=bool(exact_div),
    )

    if use_core_parallel:
        # v7x: genuinely shard the split axis across the two TensorCores.
        sem = (pltpu.CORE_PARALLEL, pltpu.ARBITRARY)
    else:
        sem = ("parallel", "arbitrary")

    out = pl.pallas_call(
        kernel,
        out_shape=jax.ShapeDtypeStruct((S * 8, 128), jnp.float32),
        grid=(S, tiles_per_split),
        in_specs=[
            pl.BlockSpec((R, tb), in_map),
            pl.BlockSpec((R, tb), in_map),
        ],
        out_specs=pl.BlockSpec((8, 128), lambda c, i: (c, 0)),
        scratch_shapes=[
            pltpu.VMEM((2, tb), jnp.float32),   # row0: numerator, row1: denom
        ],
        compiler_params=pltpu.CompilerParams(
            dimension_semantics=sem,
            vmem_limit_bytes=32 * 1024 * 1024,
        ),
    )(x, t)

    parts = out.reshape(S, 8, 128)
    numer = jnp.sum(parts[:, 0, 0])
    denom = jnp.sum(parts[:, 1, 0])
    return numer / denom


# ----------------------------------------------------------------------------
# pure-JAX reference for verification (mirrors the PyTorch module exactly)
# ----------------------------------------------------------------------------
def hybrid_loss_ref(logits, targets, class_weights, normal_weight,
                    focal_gamma=2.0, meta_loss_weight=1.0, meta_loss_beta=0.1):
    x = logits.astype(jnp.float32)
    t = targets.astype(jnp.float32)
    cw = jnp.asarray(class_weights, jnp.float32).reshape(1, -1)

    def bce(l, y):
        return jnp.maximum(l, 0.0) - l * y + jnp.log1p(jnp.exp(-jnp.abs(l)))

    def focal(l, y):
        ce = bce(l, y)
        p = jax.nn.sigmoid(l)
        p_t = p * y + (1 - p) * (1 - y)
        return ce * jnp.power(1.0 - p_t, focal_gamma)

    defect = jnp.sum(focal(x, t), axis=1, keepdims=True)
    meta_t = jnp.clip(jnp.sum(t, axis=1, keepdims=True), 0.0, 1.0)
    w = jnp.where(t == 0.0, meta_loss_beta, t)
    w = jnp.where(meta_t == 0.0, 1.0, w)
    meta_l = jnp.sum(x * w, axis=1, keepdims=True) / jnp.sum(w, axis=1, keepdims=True)
    meta = focal(meta_l, meta_t)
    final = defect + meta_loss_weight * meta
    bw = jnp.sum(cw * t, axis=1, keepdims=True)
    bw = jnp.where(bw == 0.0, normal_weight, bw)
    denom = jnp.sum(t) + jnp.sum(1.0 - meta_t)
    return jnp.sum(final * bw) / denom


if __name__ == "__main__":
    key = jax.random.PRNGKey(0)
    B, C = 8, 6  # batch of 8 samples, 6 defect classes

    k1, k2 = jax.random.split(key)
    logits = jax.random.normal(k1, (B, C), dtype=jnp.float32)
    # binary multi-label targets; some rows end up all-zero ("normal" samples)
    targets = (jax.random.uniform(k2, (B, C)) > 0.7).astype(jnp.float32)

    # deterministic class statistics for the effective-number weighting
    class_counts = np.array([50.0, 30.0, 20.0, 10.0, 5.0, 2.0], dtype=np.float64)
    normal_count = 100.0
    class_weights_np, normal_weight = get_class_weights(
        class_counts, normal_count, beta=0.9999)

    loss = hybrid_loss(logits, targets, class_weights_np, normal_weight,
                       base_loss="focal", focal_gamma=2.0,
                       meta_loss_weight=1.0, meta_loss_beta=0.1)
    loss = jax.block_until_ready(loss)

    ref = jax.block_until_ready(
        hybrid_loss_ref(logits, targets, jnp.asarray(class_weights_np),
                        normal_weight))
    np.testing.assert_allclose(np.asarray(loss), np.asarray(ref),
                               rtol=1e-4, atol=1e-6)

    print("KERNEL_OK")
</pallas_src>

<mosaic_0001>
module attributes {stable_mosaic.version = 11 : i64} {
  func.func @hybrid_loss_kernel(%arg0: i32, %arg1: i32, %arg2: memref<8x8xf32, #tpu.memory_space<vmem>>, %arg3: memref<8x8xf32, #tpu.memory_space<vmem>>, %arg4: memref<8x128xf32, #tpu.memory_space<vmem>>, %arg5: memref<2x8xf32, #tpu.memory_space<vmem>>) attributes {dimension_semantics = [#tpu.dimension_semantics<parallel>, #tpu.dimension_semantics<arbitrary>], iteration_bounds = array<i64: 1, 1>, scalar_prefetch = 0 : i64, scratch_operands = 1 : i64, tpu.core_type = #tpu.core_type<tc>, window_params = [{transform_indices = @transform_0, window_bounds = array<i64: 8, 8>}, {transform_indices = @transform_1, window_bounds = array<i64: 8, 8>}, {transform_indices = @transform_2, window_bounds = array<i64: 8, 128>}]} {
    %c0_i32 = arith.constant 0 : i32
    %0 = arith.cmpi eq, %arg1, %c0_i32 : i32
    %1 = arith.extui %0 : i1 to i32
    %c0_i32_0 = arith.constant 0 : i32
    %2 = arith.cmpi ne, %1, %c0_i32_0 : i32
    scf.if %2 {
      %cst_51 = arith.constant 0.000000e+00 : f32
      %161 = vector.broadcast %cst_51 : f32 to vector<2x8xf32>
      %c0_52 = arith.constant 0 : index
      %c0_53 = arith.constant 0 : index
      %162 = vector.load %arg5[%c0_52, %c0_53] : memref<2x8xf32, #tpu.memory_space<vmem>>, vector<2x8xf32>
      tpu.vector_store %arg5[%c0_52, %c0_53], %161 {strides = array<i32>} : memref<2x8xf32, #tpu.memory_space<vmem>>, vector<2x8xf32>,
    } else {
    }
    %c0 = arith.constant 0 : index
    %c0_1 = arith.constant 0 : index
    %3 = vector.load %arg2[%c0, %c0_1] : memref<8x8xf32, #tpu.memory_space<vmem>>, vector<8x8xf32>
    %c0_2 = arith.constant 0 : index
    %c0_3 = arith.constant 0 : index
    %4 = vector.load %arg3[%c0_2, %c0_3] : memref<8x8xf32, #tpu.memory_space<vmem>>, vector<8x8xf32>
    %5 = tpu.iota {dimensions = array<i32: 0>} : vector<8x1xi32>
    %c6_i32 = arith.constant 6 : i32
    %6 = vector.broadcast %c6_i32 : i32 to vector<8x1xi32>
    %7 = arith.cmpi slt, %5, %6 : vector<8x1xi32>
    %cst = arith.constant dense<0.000000e+00> : vector<8xf32>
    %8 = vector.multi_reduction <add>, %4, %cst [0] : vector<8x8xf32> to vector<8xf32>
    %9 = vector.shape_cast %8 : vector<8xf32> to vector<1x8xf32>
    %cst_4 = arith.constant 0.000000e+00 : f32
    %cst_5 = arith.constant 1.000000e+00 : f32
    %10 = vector.broadcast %cst_4 : f32 to vector<1x8xf32>
    %11 = arith.maximumf %10, %9 : vector<1x8xf32>
    %12 = vector.broadcast %cst_5 : f32 to vector<1x8xf32>
    %13 = arith.minimumf %12, %11 : vector<1x8xf32>
    %cst_6 = arith.constant 0.000000e+00 : f32
    %14 = vector.broadcast %cst_6 : f32 to vector<8x8xf32>
    %15 = arith.cmpf oeq, %4, %14 : vector<8x8xf32>
    %cst_7 = arith.constant 1.000000e-01 : f32
    %16 = vector.broadcast %cst_7 : f32 to vector<8x8xf32>
    %17 = arith.select %15, %16, %4 : vector<8x8xi1>, vector<8x8xf32>
    %cst_8 = arith.constant 0.000000e+00 : f32
    %18 = vector.broadcast %cst_8 : f32 to vector<1x8xf32>
    %19 = arith.cmpf oeq, %13, %18 : vector<1x8xf32>
    %cst_9 = arith.constant 1.000000e+00 : f32
    %20 = vector.shape_cast %19 : vector<1x8xi1> to vector<1x8xi1>
    %21 = vector.broadcast %20 : vector<1x8xi1> to vector<8x8xi1>
    %22 = vector.broadcast %cst_9 : f32 to vector<8x8xf32>
    %23 = arith.select %21, %22, %17 : vector<8x8xi1>, vector<8x8xf32>
    %cst_10 = arith.constant 0.000000e+00 : f32
    %24 = vector.shape_cast %7 : vector<8x1xi1> to vector<8x1xi1>
    %25 = vector.broadcast %24 : vector<8x1xi1> to vector<8x8xi1>
    %26 = vector.broadcast %cst_10 : f32 to vector<8x8xf32>
    %27 = arith.select %25, %23, %26 : vector<8x8xi1>, vector<8x8xf32>
    %28 = arith.mulf %3, %27 : vector<8x8xf32>
    %cst_11 = arith.constant dense<0.000000e+00> : vector<8xf32>
    %29 = vector.multi_reduction <add>, %28, %cst_11 [0] : vector<8x8xf32> to vector<8xf32>
    %30 = vector.shape_cast %29 : vector<8xf32> to vector<1x8xf32>
    %cst_12 = arith.constant dense<0.000000e+00> : vector<8xf32>
    %31 = vector.multi_reduction <add>, %27, %cst_12 [0] : vector<8x8xf32> to vector<8xf32>
    %32 = vector.shape_cast %31 : vector<8xf32> to vector<1x8xf32>
    %33 = tpu.reciprocal %32 {approx = true} : vector<1x8xf32> -> vector<1x8xf32>
    %34 = arith.mulf %32, %33 : vector<1x8xf32>
    %cst_13 = arith.constant 2.000000e+00 : f32
    %35 = vector.broadcast %cst_13 : f32 to vector<1x8xf32>
    %36 = arith.subf %35, %34 : vector<1x8xf32>
    %37 = arith.mulf %33, %36 : vector<1x8xf32>
    %38 = arith.mulf %30, %37 : vector<1x8xf32>
    %c6_i32_14 = arith.constant 6 : i32
    %39 = vector.broadcast %c6_i32_14 : i32 to vector<8x1xi32>
    %40 = arith.cmpi eq, %5, %39 : vector<8x1xi32>
    %41 = vector.shape_cast %40 : vector<8x1xi1> to vector<8x1xi1>
    %42 = vector.broadcast %41 : vector<8x1xi1> to vector<8x8xi1>
    %43 = vector.shape_cast %38 : vector<1x8xf32> to vector<1x8xf32>
    %44 = vector.broadcast %43 : vector<1x8xf32> to vector<8x8xf32>
    %45 = arith.select %42, %44, %3 : vector<8x8xi1>, vector<8x8xf32>
    %c6_i32_15 = arith.constant 6 : i32
    %46 = vector.broadcast %c6_i32_15 : i32 to vector<8x1xi32>
    %47 = arith.cmpi eq, %5, %46 : vector<8x1xi32>
    %48 = vector.shape_cast %47 : vector<8x1xi1> to vector<8x1xi1>
    %49 = vector.broadcast %48 : vector<8x1xi1> to vector<8x8xi1>
    %50 = vector.shape_cast %13 : vector<1x8xf32> to vector<1x8xf32>
    %51 = vector.broadcast %50 : vector<1x8xf32> to vector<8x8xf32>
    %52 = arith.select %49, %51, %4 : vector<8x8xi1>, vector<8x8xf32>
    %53 = math.absf %45 : vector<8x8xf32>
    %cst_16 = arith.constant 0.000000e+00 : f32
    %54 = vector.broadcast %cst_16 : f32 to vector<8x8xf32>
    %55 = arith.subf %54, %53 : vector<8x8xf32>
    %56 = math.exp %55 : vector<8x8xf32>
    %cst_17 = arith.constant 0.000000e+00 : f32
    %57 = vector.broadcast %cst_17 : f32 to vector<8x8xf32>
    %58 = arith.maximumf %45, %57 : vector<8x8xf32>
    %59 = arith.mulf %45, %52 : vector<8x8xf32>
    %60 = arith.subf %58, %59 : vector<8x8xf32>
    %61 = math.log1p %56 : vector<8x8xf32>
    %62 = arith.addf %60, %61 : vector<8x8xf32>
    %cst_18 = arith.constant 1.000000e+00 : f32
    %63 = vector.broadcast %cst_18 : f32 to vector<8x8xf32>
    %64 = arith.addf %63, %56 : vector<8x8xf32>
    %65 = tpu.reciprocal %64 {approx = true} : vector<8x8xf32> -> vector<8x8xf32>
    %66 = arith.mulf %64, %65 : vector<8x8xf32>
    %cst_19 = arith.constant 2.000000e+00 : f32
    %67 = vector.broadcast %cst_19 : f32 to vector<8x8xf32>
    %68 = arith.subf %67, %66 : vector<8x8xf32>
    %69 = arith.mulf %65, %68 : vector<8x8xf32>
    %cst_20 = arith.constant 0.000000e+00 : f32
    %70 = vector.broadcast %cst_20 : f32 to vector<8x8xf32>
    %71 = arith.cmpf oge, %45, %70 : vector<8x8xf32>
    %72 = arith.mulf %56, %69 : vector<8x8xf32>
    %73 = arith.select %71, %69, %72 : vector<8x8xi1>, vector<8x8xf32>
    %74 = arith.mulf %73, %52 : vector<8x8xf32>
    %cst_21 = arith.constant 1.000000e+00 : f32
    %75 = vector.broadcast %cst_21 : f32 to vector<8x8xf32>
    %76 = arith.subf %75, %73 : vector<8x8xf32>
    %cst_22 = arith.constant 1.000000e+00 : f32
    %77 = vector.broadcast %cst_22 : f32 to vector<8x8xf32>
    %78 = arith.subf %77, %52 : vector<8x8xf32>
    %79 = arith.mulf %76, %78 : vector<8x8xf32>
    %80 = arith.addf %74, %79 : vector<8x8xf32>
    %cst_23 = arith.constant 1.000000e+00 : f32
    %81 = vector.broadcast %cst_23 : f32 to vector<8x8xf32>
    %82 = arith.subf %81, %80 : vector<8x8xf32>
    %83 = arith.mulf %82, %82 : vector<8x8xf32>
    %84 = arith.mulf %62, %83 : vector<8x8xf32>
    %c6_i32_24 = arith.constant 6 : i32
    %85 = vector.broadcast %c6_i32_24 : i32 to vector<8x1xi32>
    %86 = arith.cmpi eq, %5, %85 : vector<8x1xi32>
    %cst_25 = arith.constant 1.000000e+00 : f32
    %cst_26 = arith.constant 0.000000e+00 : f32
    %87 = vector.broadcast %cst_25 : f32 to vector<8x1xf32>
    %88 = vector.broadcast %cst_26 : f32 to vector<8x1xf32>
    %89 = arith.select %86, %87, %88 : vector<8x1xi1>, vector<8x1xf32>
    %cst_27 = arith.constant 1.000000e+00 : f32
    %90 = vector.broadcast %cst_27 : f32 to vector<8x1xf32>
    %91 = arith.select %7, %90, %89 : vector<8x1xi1>, vector<8x1xf32>
    %92 = vector.broadcast %91 : vector<8x1xf32> to vector<8x8xf32>
    %93 = arith.mulf %84, %92 : vector<8x8xf32>
    %cst_28 = arith.constant dense<0.000000e+00> : vector<8xf32>
    %94 = vector.multi_reduction <add>, %93, %cst_28 [0] : vector<8x8xf32> to vector<8xf32>
    %95 = vector.shape_cast %94 : vector<8xf32> to vector<1x8xf32>
    %cst_29 = arith.constant 0.000000e+00 : f32
    %96 = vector.broadcast %cst_29 : f32 to vector<8x1xf32>
    %c0_i32_30 = arith.constant 0 : i32
    %97 = vector.broadcast %c0_i32_30 : i32 to vector<8x1xi32>
    %98 = arith.cmpi eq, %5, %97 : vector<8x1xi32>
    %cst_31 = arith.constant 0.153609321 : f32
    %99 = vector.broadcast %cst_31 : f32 to vector<8x1xf32>
    %100 = arith.select %98, %99, %96 : vector<8x1xi1>, vector<8x1xf32>
    %c1_i32 = arith.constant 1 : i32
    %101 = vector.broadcast %c1_i32 : i32 to vector<8x1xi32>
    %102 = arith.cmpi eq, %5, %101 : vector<8x1xi32>
    %cst_32 = arith.constant 0.255759805 : f32
    %103 = vector.broadcast %cst_32 : f32 to vector<8x1xf32>
    %104 = arith.select %102, %103, %100 : vector<8x1xi1>, vector<8x1xf32>
    %c2_i32 = arith.constant 2 : i32
    %105 = vector.broadcast %c2_i32 : i32 to vector<8x1xi32>
    %106 = arith.cmpi eq, %5, %105 : vector<8x1xi32>
    %cst_33 = arith.constant 3.834480e-01 : f32
    %107 = vector.broadcast %cst_33 : f32 to vector<8x1xf32>
    %108 = arith.select %106, %107, %104 : vector<8x1xi1>, vector<8x1xf32>
    %c3_i32 = arith.constant 3 : i32
    %109 = vector.broadcast %c3_i32 : i32 to vector<8x1xi32>
    %110 = arith.cmpi eq, %5, %109 : vector<8x1xi32>
    %cst_34 = arith.constant 0.766512751 : f32
    %111 = vector.broadcast %cst_34 : f32 to vector<8x1xf32>
    %112 = arith.select %110, %111, %108 : vector<8x1xi1>, vector<8x1xf32>
    %c4_i32 = arith.constant 4 : i32
    %113 = vector.broadcast %c4_i32 : i32 to vector<8x1xi32>
    %114 = arith.cmpi eq, %5, %113 : vector<8x1xi32>
    %cst_35 = arith.constant 1.53264236 : f32
    %115 = vector.broadcast %cst_35 : f32 to vector<8x1xf32>
    %116 = arith.select %114, %115, %112 : vector<8x1xi1>, vector<8x1xf32>
    %c5_i32 = arith.constant 5 : i32
    %117 = vector.broadcast %c5_i32 : i32 to vector<8x1xi32>
    %118 = arith.cmpi eq, %5, %117 : vector<8x1xi32>
    %cst_36 = arith.constant 3.83103108 : f32
    %119 = vector.broadcast %cst_36 : f32 to vector<8x1xf32>
    %120 = arith.select %118, %119, %116 : vector<8x1xi1>, vector<8x1xf32>
    %121 = vector.broadcast %120 : vector<8x1xf32> to vector<8x8xf32>
    %122 = arith.mulf %121, %4 : vector<8x8xf32>
    %cst_37 = arith.constant dense<0.000000e+00> : vector<8xf32>
    %123 = vector.multi_reduction <add>, %122, %cst_37 [0] : vector<8x8xf32> to vector<8xf32>
    %124 = vector.shape_cast %123 : vector<8xf32> to vector<1x8xf32>
    %cst_38 = arith.constant 0.000000e+00 : f32
    %125 = vector.broadcast %cst_38 : f32 to vector<1x8xf32>
    %126 = arith.cmpf oeq, %124, %125 : vector<1x8xf32>
    %cst_39 = arith.constant 0.0769966841 : f32
    %127 = vector.broadcast %cst_39 : f32 to vector<1x8xf32>
    %128 = arith.select %126, %127, %124 : vector<1x8xi1>, vector<1x8xf32>
    %129 = tpu.iota {dimensions = array<i32: 1>} : vector<1x8xi32>
    %c1_i32_40 = arith.constant 1 : i32
    %130 = arith.muli %arg0, %c1_i32_40 : i32
    %131 = arith.addi %130, %arg1 : i32
    %c8_i32 = arith.constant 8 : i32
    %132 = arith.muli %131, %c8_i32 : i32
    %133 = vector.broadcast %132 : i32 to vector<1x8xi32>
    %134 = arith.addi %129, %133 : vector<1x8xi32>
    %c8_i32_41 = arith.constant 8 : i32
    %135 = vector.broadcast %c8_i32_41 : i32 to vector<1x8xi32>
    %136 = arith.cmpi slt, %134, %135 : vector<1x8xi32>
    %137 = tpu.iota {dimensions = array<i32: 0>} : vector<2x1xi32>
    %c0_i32_42 = arith.constant 0 : i32
    %138 = vector.broadcast %c0_i32_42 : i32 to vector<2x1xi32>
    %139 = arith.cmpi eq, %137, %138 : vector<2x1xi32>
    %140 = arith.mulf %95, %128 : vector<1x8xf32>
    %cst_43 = arith.constant 1.000000e+00 : f32
    %141 = vector.broadcast %cst_43 : f32 to vector<1x8xf32>
    %142 = arith.subf %141, %13 : vector<1x8xf32>
    %143 = arith.addf %9, %142 : vector<1x8xf32>
    %144 = vector.shape_cast %139 : vector<2x1xi1> to vector<2x1xi1>
    %145 = vector.broadcast %144 : vector<2x1xi1> to vector<2x8xi1>
    %146 = vector.shape_cast %140 : vector<1x8xf32> to vector<1x8xf32>
    %147 = vector.broadcast %146 : vector<1x8xf32> to vector<2x8xf32>
    %148 = vector.shape_cast %143 : vector<1x8xf32> to vector<1x8xf32>
    %149 = vector.broadcast %148 : vector<1x8xf32> to vector<2x8xf32>
    %150 = arith.select %145, %147, %149 : vector<2x8xi1>, vector<2x8xf32>
    %c0_44 = arith.constant 0 : index
    %c0_45 = arith.constant 0 : index
    %151 = vector.load %arg5[%c0_44, %c0_45] : memref<2x8xf32, #tpu.memory_space<vmem>>, vector<2x8xf32>
    %cst_46 = arith.constant 0.000000e+00 : f32
    %152 = vector.shape_cast %136 : vector<1x8xi1> to vector<1x8xi1>
    %153 = vector.broadcast %152 : vector<1x8xi1> to vector<2x8xi1>
    %154 = vector.broadcast %cst_46 : f32 to vector<2x8xf32>
    %155 = arith.select %153, %150, %154 : vector<2x8xi1>, vector<2x8xf32>
    %156 = arith.addf %151, %155 : vector<2x8xf32>
    %c0_47 = arith.constant 0 : index
    %c0_48 = arith.constant 0 : index
    %157 = vector.load %arg5[%c0_47, %c0_48] : memref<2x8xf32, #tpu.memory_space<vmem>>, vector<2x8xf32>
    tpu.vector_store %arg5[%c0_47, %c0_48], %156 {strides = array<i32>} : memref<2x8xf32, #tpu.memory_space<vmem>>, vector<2x8xf32>,
    %c0_i32_49 = arith.constant 0 : i32
    %158 = arith.cmpi eq, %arg1, %c0_i32_49 : i32
    %159 = arith.extui %158 : i1 to i32
    %c0_i32_50 = arith.constant 0 : i32
    %160 = arith.cmpi ne, %159, %c0_i32_50 : i32
    scf.if %160 {
      %c0_51 = arith.constant 0 : index
      %c0_52 = arith.constant 0 : index
      %161 = vector.load %arg5[%c0_51, %c0_52] : memref<2x8xf32, #tpu.memory_space<vmem>>, vector<1x8xf32>
      %162 = vector.shape_cast %161 : vector<1x8xf32> to vector<1x1x8xf32>
      %cst_53 = arith.constant dense<0.000000e+00> : vector<1xf32>
      %163 = vector.multi_reduction <add>, %162, %cst_53 [1, 2] : vector<1x1x8xf32> to vector<1xf32>
      %164 = vector.shape_cast %163 : vector<1xf32> to vector<1x1x1xf32>
      %165 = vector.extract %164[0, 0, 0] : f32 from vector<1x1x1xf32>
      %c1 = arith.constant 1 : index
      %c0_54 = arith.constant 0 : index
      %166 = vector.load %arg5[%c1, %c0_54] : memref<2x8xf32, #tpu.memory_space<vmem>>, vector<1x8xf32>
      %167 = vector.shape_cast %166 : vector<1x8xf32> to vector<1x1x8xf32>
      %cst_55 = arith.constant dense<0.000000e+00> : vector<1xf32>
      %168 = vector.multi_reduction <add>, %167, %cst_55 [1, 2] : vector<1x1x8xf32> to vector<1xf32>
      %169 = vector.shape_cast %168 : vector<1xf32> to vector<1x1x1xf32>
      %170 = vector.extract %169[0, 0, 0] : f32 from vector<1x1x1xf32>
      %171 = tpu.iota {dimensions = array<i32: 0>} : vector<8x128xi32>
      %c0_i32_56 = arith.constant 0 : i32
      %172 = vector.broadcast %c0_i32_56 : i32 to vector<8x128xi32>
      %173 = arith.cmpi eq, %171, %172 : vector<8x128xi32>
      %c1_i32_57 = arith.constant 1 : i32
      %174 = vector.broadcast %c1_i32_57 : i32 to vector<8x128xi32>
      %175 = arith.cmpi eq, %171, %174 : vector<8x128xi32>
      %cst_58 = arith.constant 0.000000e+00 : f32
      %176 = vector.broadcast %170 : f32 to vector<8x128xf32>
      %177 = vector.broadcast %cst_58 : f32 to vector<8x128xf32>
      %178 = arith.select %175, %176, %177 : vector<8x128xi1>, vector<8x128xf32>
      %179 = vector.broadcast %165 : f32 to vector<8x128xf32>
      %180 = arith.select %173, %179, %178 : vector<8x128xi1>, vector<8x128xf32>
      %c0_59 = arith.constant 0 : index
      %c0_60 = arith.constant 0 : index
      %181 = vector.load %arg4[%c0_59, %c0_60] : memref<8x128xf32, #tpu.memory_space<vmem>>, vector<8x128xf32>
      tpu.vector_store %arg4[%c0_59, %c0_60], %180 {strides = array<i32>} : memref<8x128xf32, #tpu.memory_space<vmem>>, vector<8x128xf32>,
    } else {
    }
    return
  }
  func.func @transform_0(%arg0: i32, %arg1: i32) -> (i32, i32) {
    %c1_i32 = arith.constant 1 : i32
    %0 = arith.muli %arg0, %c1_i32 : i32
    %1 = arith.addi %0, %arg1 : i32
    %c0_i32 = arith.constant 0 : i32
    %2 = arith.minsi %1, %c0_i32 : i32
    %c0_i32_0 = arith.constant 0 : i32
    %c0_i32_1 = arith.constant 0 : i32
    return %c0_i32_0, %2 : i32, i32
  }
  func.func @transform_1(%arg0: i32, %arg1: i32) -> (i32, i32) {
    %c1_i32 = arith.constant 1 : i32
    %0 = arith.muli %arg0, %c1_i32 : i32
    %1 = arith.addi %0, %arg1 : i32
    %c0_i32 = arith.constant 0 : i32
    %2 = arith.minsi %1, %c0_i32 : i32
    %c0_i32_0 = arith.constant 0 : i32
    %c0_i32_1 = arith.constant 0 : i32
    return %c0_i32_0, %2 : i32, i32
  }
  func.func @transform_2(%arg0: i32, %arg1: i32) -> (i32, i32) {
    %c0_i32 = arith.constant 0 : i32
    %c0_i32_0 = arith.constant 0 : i32
    return %arg0, %c0_i32 : i32, i32
  }
}

</mosaic_0001>

<bundles_post_ra>
// kernel: tpu_custom_call.1
= control target key start
LH: loop header
LB: loop body
LE: loop exit
PB: predicated region body
PF: predicated region fallthrough
CT: control target
= control target key end

     0   :  { %7 = vsyncpa [#allocation4], 0  ;;  %s398_s0 = inlined_call_operand.hbm [shape: f32[8,8], index: 0, kind: input, shape index: {}]   ;;  %s399_s1 = inlined_call_operand.hbm [shape: f32[8,8], index: 1, kind: input, shape index: {}]   ;;  %s400_s2 = inlined_call_operand.hbm [shape: f32[8,128], index: 2, kind: output, shape index: {}]  }
   0x1   :  { %8 = vsyncpa [#allocation7], 0 }
   0x2   :  { %9 = vsyncpa [#allocation5], 0  ;;  %s325_s9 = smov [#allocation3]   ;;  %s326_s11 = smov [#allocation6]  }
   0x3   :  { %s21_s10 = sshll.u32 %s325_s9, 4  ;;  %s36_s12 = sshll.u32 %s326_s11, 4  ;;  %s22_s10 = int_to_ptr.vmem [resolvable:$true] %s21_s10  ;;  %s37_s12 = int_to_ptr.vmem [resolvable:$true] %s36_s12 }
   0x4   :  { %s267_s13 = scalar_lea.vmem %s22_s10, 128  ;;  %p272_p1 = scmp.lt.s32.totalorder %s22_s10, %s22_s10 }
   0x5   :  { %p268_p0 = scmp.ne.s32.totalorder %s22_s10, %s267_s13  ;;  %p273_p2 = scmp.lt.s32.totalorder %s267_s13, %s267_s13 }
   0x7   :  { %p274_p3 = por %p273_p2, %p272_p1 }
   0x9   :  { %p275_p4 = pnand %p274_p3, %p268_p0 }
   0xb   :  { %278 = shalt.err (!%p275_p4)
}
   0xc   :  { %24 = dma.hbm_to_vmem [thread:$0]  %s398_s0, 128, %s22_s10, [#allocation4]  }
   0xd   :  { %s287_s16 = scalar_lea.vmem %s37_s12, 128  ;;  %p292_p6 = scmp.lt.s32.totalorder %s37_s12, %s37_s12 }
   0xe   :  { %p288_p5 = scmp.ne.s32.totalorder %s37_s12, %s287_s16  ;;  %p293_p7 = scmp.lt.s32.totalorder %s287_s16, %s287_s16 }
  0x10   :  { %p294_p8 = por %p293_p7, %p292_p6 }
  0x12   :  { %p295_p9 = pnand %p294_p8, %p288_p5 }
  0x14   :  { %298 = shalt.err (!%p295_p9)
}
  0x15   :  { %39 = dma.hbm_to_vmem [thread:$0]  %s399_s1, 128, %s37_s12, [#allocation7]  }
  0x16   :  { %319 = dma.done.wait [#allocation4], 128  }
  0x17   :  { %320 = vsyncadd [#allocation4], 4294967168 }
  0x18   :  { %321 = dma.done.wait [#allocation7], 128  }
  0x19   :  { %322 = vsyncadd [#allocation7], 4294967168  ;;  %vm56_vm0 = vcmask 58368   ;;  %v60_v0 = vlaneseq  ;;  %v327_v1 = vmov 0.0   ;;  %vm63_vm1 = vcmask 64512   ;;  %v59_v7 = vld [vmem:[#allocation6] sm:$0xff] }
  0x1a   :  { %57 = vst.msk [vmem:[#allocation2] sm:$0x3] %vm56_vm0, %v327_v1  ;;  %v64_v9 = vsel %vm63_vm1, %v59_v7, 0.0  ;;  %vm73_vm10 = vcmp.eq.f32.partialorder %v59_v7, 0.0  ;;  %v58_v26 = vld [vmem:[#allocation3] sm:$0xff]  ;;  %s328_s1 = smov [#allocation8]  }
  0x1b   :  { %v352_v2 = vshrl.u32 %v60_v0, 7  ;;  %v65_v11 = vrot.slane %v64_v9, 4  ;;  %v74_v22 = vsel %vm73_vm10, 0.1, %v59_v7  ;;  %s229_s19 = sshll.u32 %s328_s1, 4  ;;  %s230_s19 = int_to_ptr.vmem [resolvable:$true] %s229_s19 }
  0x1c   :  { %s299_s21 = scalar_lea.vmem %s230_s19, 128  ;;  %p304_p11 = scmp.lt.s32.totalorder %s230_s19, %s230_s19 }
  0x1d   :  { %vm62_vm2 = vcmp.lt.s32.totalorder %v352_v2, 6  ;;  %vm102_vm3 = vcmp.eq.s32.totalorder %v352_v2, 6  ;;  %vm150_vm4 = vcmp.eq.s32.totalorder %v352_v2, 0  ;;  %vm152_vm5 = vcmp.eq.s32.totalorder %v352_v2, 1  ;;  %p300_p10 = scmp.ne.s32.totalorder %s230_s19, %s299_s21  ;;  %p305_p12 = scmp.lt.s32.totalorder %s299_s21, %s299_s21 }
  0x1e   :  { %v140_v3 = vsel %vm102_vm3, 1.0, %v327_v1  ;;  %v151_v4 = vsel %vm150_vm4, 0.15360932, %v327_v1  ;;  %vm154_vm6 = vcmp.eq.s32.totalorder %v352_v2, 2  ;;  %vm156_vm7 = vcmp.eq.s32.totalorder %v352_v2, 3 }
  0x1f   :  { %v366_v5 = vsel %vm62_vm2, 1.0, %v140_v3  ;;  %v153_v6 = vsel %vm152_vm5, 0.2557598, %v151_v4  ;;  %vm158_vm8 = vcmp.eq.s32.totalorder %v352_v2, 4  ;;  %vm160_vm9 = vcmp.eq.s32.totalorder %v352_v2, 5  ;;  %p306_p13 = por %p305_p12, %p304_p11 }
  0x20   :  { %v155_v8 = vsel %vm154_vm6, 0.383448, %v153_v6  ;;  %v66_v14 = vadd.f32 %v65_v11, %v64_v9 }
  0x21   :  { %v157_v10 = vsel %vm156_vm7, 0.76651275, %v155_v8  ;;  %p307_p0 = pnand %p306_p13, %p300_p10 }
  0x22   :  { %v159_v12 = vsel %vm158_vm8, 1.5326424, %v157_v10  ;;  %v67_v16 = vrot.slane %v66_v14, 2 }
  0x23   :  { %v161_v13 = vsel %vm160_vm9, 3.831031, %v159_v12 }
  0x24   :  { %v162_v15 = vmul.f32 %v161_v13, %v59_v7  ;;  %v68_v17 = vadd.f32 %v67_v16, %v66_v14 }
  0x26   :  { %v69_v18 = vrot.slane %v68_v17, 1  ;;  %v163_v59 = vsel %vm63_vm1, %v162_v15, 0.0 }
  0x27   :  { %v164_v3 = vrot.slane %v163_v59, 4 }
  0x28   :  { %v70_v19 = vadd.f32 %v69_v18, %v68_v17 }
  0x29   :  { %v165_v13 = vadd.f32 %v164_v3, %v163_v59 }
  0x2a   :  { %v71_v20 = vmax.f32 %v70_v19, 0.0 }
  0x2b   :  { %v166_v18 = vrot.slane %v165_v13, 2 }
  0x2c   :  { %v72_v21 = vmin.f32 %v71_v20, 1.0 }
  0x2e   :  { %vm75_vm11 = vcmp.eq.f32.partialorder %v72_v21, 0.0  ;;  %v106_v23 = vsel %vm102_vm3, %v72_v21, %v59_v7  ;;  %v180_v24 = vsub.f32 1.0, %v72_v21 }
  0x2f   :  { %v78_v25 = vsel %vm75_vm11, 1.0, %v74_v22  ;;  %v134_v7 = vsub.f32 1.0, %v106_v23  ;;  %v167_v22 = vadd.f32 %v166_v18, %v165_v13 }
  0x30   :  { %v81_v27 = vsel %vm62_vm2, %v78_v25, 0.0  ;;  %v377_v28 = vadd.f32 %v180_v24, %v70_v19 }
  0x31   :  { %v90_v29 = vsel %vm63_vm1, %v81_v27, 0.0  ;;  %v82_v31 = vmul.f32 %v81_v27, %v58_v26 }
  0x32   :  { %v91_v30 = vrot.slane %v90_v29, 4 }
  0x33   :  { %v83_v34 = vsel %vm63_vm1, %v82_v31, 0.0 }
  0x34   :  { %v92_v32 = vadd.f32 %v91_v30, %v90_v29  ;;  %v84_v36 = vrot.slane %v83_v34, 4 }
  0x36   :  { %v93_v33 = vrot.slane %v92_v32, 2  ;;  %v85_v39 = vadd.f32 %v84_v36, %v83_v34  ;;  %v173_v34 = vand.u32 127, %v60_v0 }
  0x38   :  { %v94_v35 = vadd.f32 %v93_v33, %v92_v32  ;;  %v86_v40 = vrot.slane %v85_v39, 2  ;;  %vm178_vm15 = vcmp.lt.s32.totalorder %v173_v34, 8 }
  0x3a   :  { %v95_v37 = vrot.slane %v94_v35, 1  ;;  %v87_v41 = vadd.f32 %v86_v40, %v85_v39 }
  0x3c   :  { %v96_v38 = vadd.f32 %v95_v37, %v94_v35  ;;  %v88_v42 = vrot.slane %v87_v41, 1 }
  0x3e   :  { %251 = vrcp.f32 %v96_v38  ;;  %v89_v45 = vadd.f32 %v88_v42, %v87_v41 }
  0x4b   :  { %v252_v43 = vpop.eup %251 }
  0x4c   :  { %v98_v44 = vmul.f32 %v252_v43, %v96_v38  ;;  %v185_v38 = vld [vmem:[#allocation2] sm:$0x3] }
  0x4e   :  { %v99_v46 = vsub.f32 2.0, %v98_v44 }
  0x50   :  { %v100_v47 = vmul.f32 %v252_v43, %v99_v46 }
  0x52   :  { %v101_v48 = vmul.f32 %v100_v47, %v89_v45 }
  0x54   :  { %v105_v49 = vsel %vm102_vm3, %v101_v48, %v58_v26  ;;  %v168_v26 = vrot.slane %v167_v22, 1 }
  0x55   :  { %v107_v50 = vand.u32 2147483647, %v105_v49  ;;  %vm129_vm12 = vcmp.ge.f32.partialorder %v105_v49, 0.0  ;;  %v111_v4 = vmax.f32 %v105_v49, 0.0  ;;  %v112_v6 = vmul.f32 %v106_v23, %v105_v49 }
  0x57   :  { %v108_v51 = vsub.f32 0.0, %v107_v50  ;;  %v113_v14 = vsub.f32 %v111_v4, %v112_v6 }
  0x59   :  { %v109_v52 = vmul.f32 1.442695, %v108_v51 }
  0x5b   :  { %253 = vpow2.f32 %v109_v52 }
  0x68   :  { %v254_v53 = vpop.eup %253 }
  0x69   :  { %v114_v54 = vadd.f32 1.0, %v254_v53  ;;  %v117_v56 = vmul.f32 -0.5, %v254_v53  ;;  %v120_v63 = vand.u32 2147483647, %v254_v53 }
  0x6b   :  { %255 = vrcp.f32 %v114_v54  ;;  %v118_v60 = vadd.f32 1.0, %v117_v56  ;;  %vm121_vm13 = vcmp.lt.f32.partialorder %v120_v63, 0.0004427343 }
  0x6c   :  { %257 = vlog2.f32 %v114_v54 }
  0x6d   :  { %v119_v9 = vmul.f32 %v254_v53, %v118_v60 }
  0x78   :  { %v256_v55 = vpop.eup %255 }
  0x79   :  { %v126_v57 = vmul.f32 %v256_v55, %v114_v54  ;;  %v258_v62 = vpop.eup %257 }
  0x7a   :  { %v116_v8 = vmul.f32 0.6931472, %v258_v62 }
  0x7b   :  { %v127_v58 = vsub.f32 2.0, %v126_v57 }
  0x7c   :  { %v122_v15 = vsel %vm121_vm13, %v119_v9, %v116_v8 }
  0x7d   :  { %v128_v61 = vmul.f32 %v256_v55, %v127_v58  ;;  %v123_v19 = vadd.f32 %v122_v15, %v113_v14 }
  0x7f   :  { %v130_v1 = vmul.f32 %v254_v53, %v128_v61 }
  0x81   :  { %v131_v10 = vsel %vm129_vm12, %v128_v61, %v130_v1 }
  0x82   :  { %v132_v11 = vmul.f32 %v131_v10, %v106_v23  ;;  %v133_v12 = vsub.f32 1.0, %v131_v10  ;;  %v169_v23 = vadd.f32 %v168_v26, %v167_v22 }
  0x84   :  { %v135_v16 = vmul.f32 %v134_v7, %v133_v12  ;;  %vm170_vm14 = vcmp.eq.f32.partialorder %v169_v23, 0.0 }
  0x85   :  { %v171_v35 = vsel %vm170_vm14, 0.076996684, %v169_v23 }
  0x86   :  { %v136_v17 = vadd.f32 %v135_v16, %v132_v11 }
  0x88   :  { %v137_v20 = vsub.f32 1.0, %v136_v17 }
  0x8a   :  { %v138_v21 = vmul.f32 %v137_v20, %v137_v20 }
  0x8c   :  { %v139_v24 = vmul.f32 %v138_v21, %v123_v19 }
  0x8e   :  { %v142_v25 = vmul.f32 %v366_v5, %v139_v24 }
  0x90   :  { %v143_v27 = vsel %vm63_vm1, %v142_v25, 0.0  ;;  %vm196_vm1 = vcmask 57344  }
  0x91   :  { %v144_v29 = vrot.slane %v143_v27, 4 }
  0x93   :  { %v145_v30 = vadd.f32 %v144_v29, %v143_v27 }
  0x95   :  { %v146_v31 = vrot.slane %v145_v30, 2 }
  0x97   :  { %v147_v32 = vadd.f32 %v146_v31, %v145_v30 }
  0x99   :  { %v148_v33 = vrot.slane %v147_v32, 1 }
  0x9b   :  { %v149_v36 = vadd.f32 %v148_v33, %v147_v32 }
  0x9d   :  { %v179_v37 = vmul.f32 %v171_v35, %v149_v36 }
  0x9f   :  { %v184_v5 = vsel %vm150_vm4, %v179_v37, %v377_v28 }
  0xa0   :  { %v188_v39 = vsel %vm178_vm15, %v184_v5, 0.0 }
  0xa1   :  { %v189_v40 = vadd.f32 %v188_v39, %v185_v38 }
  0xa3   :  { %191 = vst.msk [vmem:[#allocation2] sm:$0x3] %vm56_vm0, %v189_v40 }
  0xaa   :  { %v195_v41 = vld [vmem:[#allocation2] sm:$0x1]  ;;  %v207_v42 = vld [vmem:[#allocation2 + $0x1] sm:$0x1] }
  0xab   :  { %v197_v43 = vsel %vm196_vm1, %v195_v41, 0.0  ;;  %v208_v44 = vsel %vm196_vm1, %v207_v42, 0.0 }
  0xac   :  { %198 = vadd.xlane.f32.xlu0 %v197_v43 }
  0xb0   :  { %209 = vadd.xlane.f32.xlu0 %v208_v44 }
 0x135   :  { %v199_v0 = vpop.xlane.xlu0 %198 }
 0x136   :  { %v200_v45 = vrot.slane %v199_v0, 4 }
 0x138   :  { %v201_v46 = vadd.f32 %v200_v45, %v199_v0 }
 0x139   :  { %v210_v47 = vpop.xlane.xlu0 %209 }
 0x13a   :  { %v202_v48 = vrot.slane %v201_v46, 2  ;;  %v211_v49 = vrot.slane %v210_v47, 4 }
 0x13c   :  { %v212_v50 = vadd.f32 %v211_v49, %v210_v47  ;;  %v203_v51 = vadd.f32 %v202_v48, %v201_v46 }
 0x13e   :  { %v213_v28 = vrot.slane %v212_v50, 2  ;;  %v204_v52 = vrot.slane %v203_v51, 1 }
 0x140   :  { %v214_v53 = vadd.f32 %v213_v28, %v212_v50  ;;  %v205_v54 = vadd.f32 %v204_v52, %v203_v51 }
 0x142   :  { %243 = vpush %v205_v54  ;;  %v215_v55 = vrot.slane %v214_v53, 1 }
 0x144   :  { %v216_v56 = vadd.f32 %v215_v55, %v214_v53 }
 0x146   :  { %245 = vpush %v216_v56 }
 0x173   :  { %s244_s0 = spop %243 }
 0x174   :  { %v220_v58 = vstv %s244_s0 }
 0x177   :  { %s246_s20 = spop %245 }
 0x178   :  { %v218_v57 = vstv %s246_s20 }
 0x179   :  { %v219_v59 = vsel %vm152_vm5, %v218_v57, 0.0 }
 0x17a   :  { %v221_v60 = vsel %vm150_vm4, %v220_v58, %v219_v59 }
 0x17b   :  { %222 = vst [vmem:[#allocation8] sm:$0xff] %v221_v60 }
 0x17c   :  { %310 = shalt.err (!%p307_p0)
}
 0x17d   :  { %232 = dma.vmem_to_hbm [thread:$0]  %s230_s19, 128, %s400_s2, [#allocation5]  }
 0x17e   :  { %323 = dma.done.wait [#allocation5], 128  }
 0x17f   :  { %324 = vsyncadd [#allocation5], 4294967168 }
 0x180   :  { %236 = vsyncpa [#allocation4], 1 }
 0x181   :  { %237 = vsyncpa [#allocation7], 1 }
 0x182   :  { %238 = vsyncpa [#allocation5], 1 }

</bundles_post_ra>
